<compile_context>
chip_gen: v7x
topology: tpu7x:2x2x1
jax: 0.10.0
libtpu: 0.0.40
codegen_flags: <defaults>
</compile_context>

<pallas_src>
import jax
import jax.numpy as jnp
from jax.experimental import pallas as pl
from jax.experimental.pallas import tpu as pltpu


def _round_up(n, m):
    return ((n + m - 1) // m) * m


def _choose_batch_tile(B, FK, itemsize):
    """Batch tile: multiple of 128, sized so the double-buffered input tile
    (~2 x 6 MiB) stays well under v7x's 64 MiB VMEM while amortizing the
    ~0.35 us per-grid-step overhead."""
    row_bytes = FK * itemsize
    budget = 6 * 1024 * 1024                      # per-tile; x2 for double buffering
    tb = (budget // row_bytes) // 128 * 128
    if tb < 128:
        # Very large F*K: fall back to the smallest sublane-aligned tile that
        # still fits the budget instead of silently blowing VMEM.
        # TODO(synk): for extreme F*K, tile the feature axis as a second
        # "arbitrary" grid dim with a pl.when-initialized accumulator.
        tb = max(8, (budget // row_bytes) // 8 * 8)
        return int(min(tb, _round_up(B, 8)))
    tb = min(tb, 8192)
    # Keep at least two grid steps when the batch allows it so v7x's two
    # TensorCores (dimension_semantics=("parallel",)) both get work.
    if 128 < B <= tb:
        tb = _round_up(pl.cdiv(B, 2), 128)
    tb = min(tb, _round_up(B, 128))
    return int(max(tb, 128))


def fm_layer(x, reduce_sum=True):
    """Pallas implementation of FMLayer.forward.

    x: (batch_size, num_features, k) float array.
    """
    B, F, K = x.shape
    out_dtype = x.dtype
    itemsize = jnp.dtype(x.dtype).itemsize
    FK = F * K

    TB = _choose_batch_tile(B, FK, itemsize)
    num_tiles = pl.cdiv(B, TB)

    # Free contiguous-merge reshape; no jnp.pad (rows are independent, the
    # ragged last block is handled by Pallas' masked reads/stores).
    x_flat = x.reshape(B, FK)

    # Stacked-identity selection matrix: x_flat @ SEL == sum over features.
    # Exact 0/1 values; runs the feature reduction on the otherwise-idle MXU.
    sel = jnp.tile(jnp.eye(K, dtype=jnp.float32), (F, 1))        # (FK, K)

    def _interaction(x_ref, sel_ref):
        # f32 cast is a no-op for f32 inputs; kept for bf16 so the elementwise
        # square (and the square_of_sum - sum_of_square cancellation) stays in
        # f32.  The same temp feeds both MXU contractions.
        xf = x_ref[...].astype(jnp.float32)                      # (TB, FK)
        sel_v = sel_ref[...]                                     # (FK, K)
        s = jnp.dot(xf, sel_v, preferred_element_type=jnp.float32)        # (TB, K)
        ss = jnp.dot(xf * xf, sel_v, preferred_element_type=jnp.float32)  # (TB, K)
        return 0.5 * (s * s - ss)

    if reduce_sum:
        def kernel(x_ref, sel_ref, o_ref):
            ix = _interaction(x_ref, sel_ref)
            # Output is tiny (1/(F*K) of the input bytes); a (TB, 1) store
            # avoids the per-tile sublane->lane relayout a (1, TB) row needs.
            o_ref[...] = jnp.sum(ix, axis=1, keepdims=True).astype(o_ref.dtype)

        out_shape = jax.ShapeDtypeStruct((B, 1), out_dtype)
        out_spec = pl.BlockSpec((TB, 1), lambda i: (i, 0))
        out_bytes = B * itemsize
    else:
        def kernel(x_ref, sel_ref, o_ref):
            o_ref[...] = _interaction(x_ref, sel_ref).astype(o_ref.dtype)

        out_shape = jax.ShapeDtypeStruct((B, K), out_dtype)
        out_spec = pl.BlockSpec((TB, K), lambda i: (i, 0))
        out_bytes = B * K * itemsize

    cost = pl.CostEstimate(
        flops=4 * B * FK * K + 4 * B * K,
        transcendentals=0,
        bytes_accessed=B * FK * itemsize + FK * K * 4 + out_bytes,
    )

    out = pl.pallas_call(
        kernel,
        out_shape=out_shape,
        grid=(num_tiles,),
        in_specs=[
            pl.BlockSpec((TB, FK), lambda i: (i, 0)),
            pl.BlockSpec((FK, K), lambda i: (0, 0)),   # constant block: fetched once
        ],
        out_specs=out_spec,
        compiler_params=pltpu.CompilerParams(
            dimension_semantics=("parallel",),
            vmem_limit_bytes=40 * 1024 * 1024,
        ),
        cost_estimate=cost,
    )(x_flat, sel)

    return out


def fm_layer_ref(x, reduce_sum=True):
    square_of_sum = jnp.sum(x, axis=1) ** 2
    sum_of_square = jnp.sum(x ** 2, axis=1)
    ix = square_of_sum - sum_of_square
    if reduce_sum:
        ix = jnp.sum(ix, axis=1, keepdims=True)
    return 0.5 * ix


if __name__ == "__main__":
    key = jax.random.PRNGKey(0)
    batch, num_features, k = 2, 4, 32
    x = jax.random.normal(key, (batch, num_features, k), dtype=jnp.float32)

    # reduce_sum=True path
    out = fm_layer(x, reduce_sum=True)
    jax.block_until_ready(out)
    ref = fm_layer_ref(x, reduce_sum=True)
    assert out.shape == (batch, 1), out.shape
    assert jnp.allclose(out, ref, atol=1e-4, rtol=1e-4), (out, ref)

    # reduce_sum=False path
    out2 = fm_layer(x, reduce_sum=False)
    jax.block_until_ready(out2)
    ref2 = fm_layer_ref(x, reduce_sum=False)
    assert out2.shape == (batch, k), out2.shape
    assert jnp.allclose(out2, ref2, atol=1e-4, rtol=1e-4)

    # Multi-tile + ragged-last-block path (no wrapper jnp.pad anymore).
    x_big = jax.random.normal(jax.random.PRNGKey(1), (200, num_features, k),
                              dtype=jnp.float32)
    out3 = fm_layer(x_big, reduce_sum=True)
    jax.block_until_ready(out3)
    ref3 = fm_layer_ref(x_big, reduce_sum=True)
    assert out3.shape == (200, 1), out3.shape
    assert jnp.allclose(out3, ref3, atol=1e-4, rtol=1e-4)

    print("KERNEL_OK")
</pallas_src>

<mosaic_0001>
module attributes {stable_mosaic.version = 11 : i64} {
  func.func @kernel(%arg0: i32, %arg1: memref<128x128xf32, #tpu.memory_space<vmem>>, %arg2: memref<128x32xf32, #tpu.memory_space<vmem>>, %arg3: memref<128x1xf32, #tpu.memory_space<vmem>>) attributes {dimension_semantics = [#tpu.dimension_semantics<parallel>], iteration_bounds = array<i64: 1>, scalar_prefetch = 0 : i64, scratch_operands = 0 : i64, tpu.core_type = #tpu.core_type<tc>, window_params = [{transform_indices = @transform_0, window_bounds = array<i64: 128, 128>}, {pipeline_mode = #tpu.pipeline_mode<synchronous>, transform_indices = @transform_1, window_bounds = array<i64: 128, 32>}, {transform_indices = @transform_2, window_bounds = array<i64: 128, 1>}]} {
    %c0 = arith.constant 0 : index
    %c0_0 = arith.constant 0 : index
    %0 = vector.load %arg1[%c0, %c0_0] : memref<128x128xf32, #tpu.memory_space<vmem>>, vector<128x128xf32>
    %c0_1 = arith.constant 0 : index
    %c0_2 = arith.constant 0 : index
    %1 = vector.load %arg2[%c0_1, %c0_2] : memref<128x32xf32, #tpu.memory_space<vmem>>, vector<128x32xf32>
    %cst = arith.constant dense<0.000000e+00> : vector<128x32xf32>
    %2 = tpu.matmul %0, %1, %cst {dimension_numbers = #tpu.dot_dimension_numbers<[1], [0], [0], [1], [0, 0, 1, 1], [], []>} : vector<128x128xf32>, vector<128x32xf32>, vector<128x32xf32> -> vector<128x32xf32>
    %3 = arith.mulf %0, %0 : vector<128x128xf32>
    %cst_3 = arith.constant dense<0.000000e+00> : vector<128x32xf32>
    %4 = tpu.matmul %3, %1, %cst_3 {dimension_numbers = #tpu.dot_dimension_numbers<[1], [0], [0], [1], [0, 0, 1, 1], [], []>} : vector<128x128xf32>, vector<128x32xf32>, vector<128x32xf32> -> vector<128x32xf32>
    %5 = arith.mulf %2, %2 : vector<128x32xf32>
    %6 = arith.subf %5, %4 : vector<128x32xf32>
    %cst_4 = arith.constant 5.000000e-01 : f32
    %7 = vector.broadcast %cst_4 : f32 to vector<128x32xf32>
    %8 = arith.mulf %7, %6 : vector<128x32xf32>
    %cst_5 = arith.constant dense<0.000000e+00> : vector<128xf32>
    %9 = vector.multi_reduction <add>, %8, %cst_5 [1] : vector<128x32xf32> to vector<128xf32>
    %10 = vector.shape_cast %9 : vector<128xf32> to vector<128x1xf32>
    %c0_6 = arith.constant 0 : index
    %c0_7 = arith.constant 0 : index
    %11 = vector.load %arg3[%c0_6, %c0_7] : memref<128x1xf32, #tpu.memory_space<vmem>>, vector<128x1xf32>
    tpu.vector_store %arg3[%c0_6, %c0_7], %10 {strides = array<i32>} : memref<128x1xf32, #tpu.memory_space<vmem>>, vector<128x1xf32>,
    return
  }
  func.func @transform_0(%arg0: i32) -> (i32, i32) {
    %c0_i32 = arith.constant 0 : i32
    %c0_i32_0 = arith.constant 0 : i32
    return %arg0, %c0_i32 : i32, i32
  }
  func.func @transform_1(%arg0: i32) -> (i32, i32) {
    %c0_i32 = arith.constant 0 : i32
    %c0_i32_0 = arith.constant 0 : i32
    %c0_i32_1 = arith.constant 0 : i32
    return %c0_i32, %c0_i32_0 : i32, i32
  }
  func.func @transform_2(%arg0: i32) -> (i32, i32) {
    %c0_i32 = arith.constant 0 : i32
    %c0_i32_0 = arith.constant 0 : i32
    return %arg0, %c0_i32 : i32, i32
  }
}

</mosaic_0001>

<bundles_post_ra>
// kernel: tpu_custom_call.1
= control target key start
LH: loop header
LB: loop body
LE: loop exit
PB: predicated region body
PF: predicated region fallthrough
CT: control target
= control target key end

     0   :  { %vm397_vm0 = vcmask 261120   ;;  %vm446_vm1 = vcmask 7168   ;;  %s872_s0 = inlined_call_operand.vmem [shape: f32[2,128], index: 0, kind: input, shape index: {}]   ;;  %s873_s1 = inlined_call_operand.vmem [shape: f32[128,32], index: 1, kind: input, shape index: {}]   ;;  %s874_s2 = inlined_call_operand.vmem [shape: f32[2,1], index: 2, kind: output, shape index: {}]  }
   0x1   :  { %v27_v0 = vld [vmem:[%s873_s1] sm:$0xff]  ;;  %v28_v1 = vld [vmem:[%s873_s1 + $0x8] sm:$0xff]  ;;  %v29_v2 = vld [vmem:[%s873_s1 + $0x10] sm:$0xff] }
   0x2   :  { %v678_v3 = vpack.c.bf16 %v28_v1, %v27_v0  ;;  %v30_v4 = vld [vmem:[%s873_s1 + $0x18] sm:$0xff]  ;;  %v31_v6 = vld [vmem:[%s873_s1 + $0x20] sm:$0xff]  ;;  %v32_v7 = vld [vmem:[%s873_s1 + $0x28] sm:$0xff] }
   0x3   :  { %v682_v5 = vpack.c.bf16 %v30_v4, %v29_v2  ;;  %v686_v8 = vpack.c.bf16 %v32_v7, %v31_v6  ;;  %v11_v9 = vld [vmem:[%s872_s0] sm:$0xff]  ;;  %v33_v10 = vld [vmem:[%s873_s1 + $0x30] sm:$0xff]  ;;  %v34_v11 = vld [vmem:[%s873_s1 + $0x38] sm:$0xff] }
   0x4   :  { %679 = vmatprep.subr.bf16.mxu0 %v678_v3  ;;  %711 = vmatprep.subr.bf16.mxu1 %v678_v3  ;;  %v188_v12 = vmul.f32 %v11_v9, %v11_v9  ;;  %v690_v13 = vpack.c.bf16 %v34_v11, %v33_v10  ;;  %v35_v14 = vld [vmem:[%s873_s1 + $0x40] sm:$0xff]  ;;  %v36_v15 = vld [vmem:[%s873_s1 + $0x48] sm:$0xff]  ;;  %v37_v17 = vld [vmem:[%s873_s1 + $0x50] sm:$0xff] }
   0x5   :  { %681 = vmatpush3.bf16.msra.mxu0 %v678_v3  ;;  %713 = vmatpush3.bf16.msra.mxu1 %v678_v3  ;;  %v694_v16 = vpack.c.bf16 %v36_v15, %v35_v14  ;;  %v38_v18 = vld [vmem:[%s873_s1 + $0x58] sm:$0xff]  ;;  %v39_v20 = vld [vmem:[%s873_s1 + $0x60] sm:$0xff]  ;;  %v40_v21 = vld [vmem:[%s873_s1 + $0x68] sm:$0xff] }
   0x6   :  { %683 = vmatprep.subr.bf16.mxu0 %v682_v5  ;;  %715 = vmatprep.subr.bf16.mxu1 %v682_v5  ;;  %v698_v19 = vpack.c.bf16 %v38_v18, %v37_v17  ;;  %v702_v22 = vpack.c.bf16 %v40_v21, %v39_v20  ;;  %v41_v23 = vld [vmem:[%s873_s1 + $0x70] sm:$0xff]  ;;  %v42_v24 = vld [vmem:[%s873_s1 + $0x78] sm:$0xff]  ;;  %v12_v26 = vld [vmem:[%s872_s0 + $0x8] sm:$0xff] }
   0x7   :  { %598 = vmatprep.mubr.f32.mxu0 %v11_v9  ;;  %654 = vmatprep.mubr.f32.mxu1 %v188_v12  ;;  %v706_v25 = vpack.c.bf16 %v42_v24, %v41_v23  ;;  %v13_v27 = vld [vmem:[%s872_s0 + $0x10] sm:$0xff]  ;;  %v189_v28 = vmul.f32 %v12_v26, %v12_v26  ;;  %v14_v30 = vld [vmem:[%s872_s0 + $0x18] sm:$0xff]  ;;  %v15_v31 = vld [vmem:[%s872_s0 + $0x20] sm:$0xff] }
   0x8   :  { %v190_v29 = vmul.f32 %v13_v27, %v13_v27  ;;  %v191_v32 = vmul.f32 %v14_v30, %v14_v30  ;;  %v192_v33 = vmul.f32 %v15_v31, %v15_v31  ;;  %v16_v34 = vld [vmem:[%s872_s0 + $0x28] sm:$0xff]  ;;  %v17_v35 = vld [vmem:[%s872_s0 + $0x30] sm:$0xff]  ;;  %v18_v38 = vld [vmem:[%s872_s0 + $0x38] sm:$0xff] }
   0x9   :  { %685 = vmatpush3.bf16.msra.mxu0 %v682_v5  ;;  %717 = vmatpush3.bf16.msra.mxu1 %v682_v5  ;;  %v193_v36 = vmul.f32 %v16_v34, %v16_v34  ;;  %v194_v37 = vmul.f32 %v17_v35, %v17_v35  ;;  %v19_v39 = vld [vmem:[%s872_s0 + $0x40] sm:$0xff]  ;;  %v195_v40 = vmul.f32 %v18_v38, %v18_v38  ;;  %v20_v42 = vld [vmem:[%s872_s0 + $0x48] sm:$0xff]  ;;  %v21_v43 = vld [vmem:[%s872_s0 + $0x50] sm:$0xff] }
   0xa   :  { %687 = vmatprep.subr.bf16.mxu0 %v686_v8  ;;  %719 = vmatprep.subr.bf16.mxu1 %v686_v8  ;;  %v196_v41 = vmul.f32 %v19_v39, %v19_v39  ;;  %v197_v44 = vmul.f32 %v20_v42, %v20_v42  ;;  %v198_v45 = vmul.f32 %v21_v43, %v21_v43  ;;  %v22_v46 = vld [vmem:[%s872_s0 + $0x58] sm:$0xff]  ;;  %v23_v47 = vld [vmem:[%s872_s0 + $0x60] sm:$0xff]  ;;  %v24_v50 = vld [vmem:[%s872_s0 + $0x68] sm:$0xff] }
   0xb   :  { %v199_v48 = vmul.f32 %v22_v46, %v22_v46  ;;  %v200_v49 = vmul.f32 %v23_v47, %v23_v47  ;;  %v25_v51 = vld [vmem:[%s872_s0 + $0x70] sm:$0xff]  ;;  %v201_v52 = vmul.f32 %v24_v50, %v24_v50  ;;  %v26_v54 = vld [vmem:[%s872_s0 + $0x78] sm:$0xff] }
   0xc   :  { %v202_v53 = vmul.f32 %v25_v51, %v25_v51  ;;  %v203_v55 = vmul.f32 %v26_v54, %v26_v54 }
   0xd   :  { %689 = vmatpush3.bf16.msra.mxu0 %v686_v8  ;;  %721 = vmatpush3.bf16.msra.mxu1 %v686_v8 }
   0xe   :  { %691 = vmatprep.subr.bf16.mxu0 %v690_v13  ;;  %723 = vmatprep.subr.bf16.mxu1 %v690_v13 }
  0x11   :  { %693 = vmatpush3.bf16.msra.mxu0 %v690_v13  ;;  %725 = vmatpush3.bf16.msra.mxu1 %v690_v13 }
  0x12   :  { %695 = vmatprep.subr.bf16.mxu0 %v694_v16  ;;  %727 = vmatprep.subr.bf16.mxu1 %v694_v16 }
  0x15   :  { %697 = vmatpush3.bf16.msra.mxu0 %v694_v16  ;;  %729 = vmatpush3.bf16.msra.mxu1 %v694_v16 }
  0x16   :  { %699 = vmatprep.subr.bf16.mxu0 %v698_v19  ;;  %731 = vmatprep.subr.bf16.mxu1 %v698_v19 }
  0x19   :  { %701 = vmatpush3.bf16.msra.mxu0 %v698_v19  ;;  %733 = vmatpush3.bf16.msra.mxu1 %v698_v19 }
  0x1a   :  { %703 = vmatprep.subr.bf16.mxu0 %v702_v22  ;;  %735 = vmatprep.subr.bf16.mxu1 %v702_v22 }
  0x1d   :  { %705 = vmatpush3.bf16.msra.mxu0 %v702_v22  ;;  %737 = vmatpush3.bf16.msra.mxu1 %v702_v22 }
  0x1e   :  { %707 = vmatprep.subr.bf16.mxu0 %v706_v25  ;;  %739 = vmatprep.subr.bf16.mxu1 %v706_v25 }
  0x21   :  { %709 = vmatpush3.bf16.msra.mxu0 %v706_v25  ;;  %741 = vmatpush3.bf16.msra.mxu1 %v706_v25 }
  0x24   :  { %599 = vmatmul.mubr.f32.vlgmr.msra.gmra.mrb[0].mxu0 %v12_v26  ;;  %655 = vmatmul.mubr.f32.vlgmr.msra.gmra.mrb[0].mxu1 %v189_v28 }
  0x25   :  { %601 = vmatprep.mubr.f32.mxu0 %v13_v27  ;;  %657 = vmatprep.mubr.f32.mxu1 %v190_v29 }
  0x28   :  { %602 = vmatmul.mubr.f32.gmra.mrb[2].mxu0 %v14_v30  ;;  %658 = vmatmul.mubr.f32.gmra.mrb[2].mxu1 %v191_v32 }
  0x29   :  { %604 = vmatprep.mubr.f32.mxu0 %v15_v31  ;;  %660 = vmatprep.mubr.f32.mxu1 %v192_v33 }
  0x2c   :  { %605 = vmatmul.mubr.f32.gmra.mrb[4].mxu0 %v16_v34  ;;  %661 = vmatmul.mubr.f32.gmra.mrb[4].mxu1 %v193_v36 }
  0x2d   :  { %607 = vmatprep.mubr.f32.mxu0 %v17_v35  ;;  %663 = vmatprep.mubr.f32.mxu1 %v194_v37 }
  0x30   :  { %608 = vmatmul.mubr.f32.gmra.mrb[6].mxu0 %v18_v38  ;;  %664 = vmatmul.mubr.f32.gmra.mrb[6].mxu1 %v195_v40 }
  0x31   :  { %610 = vmatprep.mubr.f32.mxu0 %v19_v39  ;;  %666 = vmatprep.mubr.f32.mxu1 %v196_v41 }
  0x34   :  { %611 = vmatmul.mubr.f32.gmra.mrb[8].mxu0 %v20_v42  ;;  %667 = vmatmul.mubr.f32.gmra.mrb[8].mxu1 %v197_v44 }
  0x35   :  { %613 = vmatprep.mubr.f32.mxu0 %v21_v43  ;;  %669 = vmatprep.mubr.f32.mxu1 %v198_v45 }
  0x38   :  { %614 = vmatmul.mubr.f32.gmra.mrb[10].mxu0 %v22_v46  ;;  %670 = vmatmul.mubr.f32.gmra.mrb[10].mxu1 %v199_v48 }
  0x39   :  { %616 = vmatprep.mubr.f32.mxu0 %v23_v47  ;;  %672 = vmatprep.mubr.f32.mxu1 %v200_v49 }
  0x3c   :  { %617 = vmatmul.mubr.f32.gmra.mrb[12].mxu0 %v24_v50  ;;  %673 = vmatmul.mubr.f32.gmra.mrb[12].mxu1 %v201_v52 }
  0x3d   :  { %619 = vmatprep.mubr.f32.mxu0 %v25_v51  ;;  %675 = vmatprep.mubr.f32.mxu1 %v202_v53 }
  0x40   :  { %620 = vmatmul.mubr.f32.gmra.mrb[14].mxu0 %v26_v54  ;;  %676 = vmatmul.mubr.f32.gmra.mrb[14].mxu1 %v203_v55 }
  0xf7   :  { %v600_v56 = vpop.f32.mrb[0].mxu0  ;;  %v656_v57 = vpop.f32.mrb[0].mxu1 }
  0xf8   :  { %v350_v58 = vmul.f32 %v600_v56, %v600_v56  ;;  %v109_v59 = vpop.f32.mrb[1].mxu0  ;;  %v270_v60 = vpop.f32.mrb[1].mxu1 }
  0xf9   :  { %v349_v61 = vmul.f32 %v109_v59, %v109_v59 }
  0xfa   :  { %v366_v62 = vsub.f32 %v350_v58, %v656_v57 }
  0xfb   :  { %v365_v63 = vsub.f32 %v349_v61, %v270_v60  ;;  %v603_v0 = vpop.f32.mrb[2].mxu0  ;;  %v659_v1 = vpop.f32.mrb[2].mxu1 }
  0xfc   :  { %v382_v2 = vmul.f32 0.5, %v366_v62  ;;  %v352_v3 = vmul.f32 %v603_v0, %v603_v0  ;;  %v119_v4 = vpop.f32.mrb[3].mxu0  ;;  %v280_v5 = vpop.f32.mrb[3].mxu1 }
  0xfd   :  { %v351_v6 = vmul.f32 %v119_v4, %v119_v4  ;;  %v381_v7 = vmul.f32 0.5, %v365_v63 }
  0xfe   :  { %v368_v8 = vsub.f32 %v352_v3, %v659_v1  ;;  %v401_v9 = vsel %vm397_vm0, %v382_v2, 0.0 }
  0xff   :  { %v367_v10 = vsub.f32 %v351_v6, %v280_v5  ;;  %402 = vadd.xlane.f32.xlu0 %v401_v9  ;;  %v606_v11 = vpop.f32.mrb[4].mxu0  ;;  %v662_v12 = vpop.f32.mrb[4].mxu1  ;;  %v398_v20 = vsel %vm397_vm0, %v381_v7, 0.0 }
 0x100   :  { %v384_v13 = vmul.f32 0.5, %v368_v8  ;;  %v354_v14 = vmul.f32 %v606_v11, %v606_v11  ;;  %v129_v15 = vpop.f32.mrb[5].mxu0  ;;  %v290_v16 = vpop.f32.mrb[5].mxu1 }
 0x101   :  { %v353_v17 = vmul.f32 %v129_v15, %v129_v15  ;;  %v383_v18 = vmul.f32 0.5, %v367_v10 }
 0x102   :  { %v370_v19 = vsub.f32 %v354_v14, %v662_v12  ;;  %v407_v21 = vsel %vm397_vm0, %v384_v13, 0.0 }
 0x103   :  { %399 = vadd.xlane.f32.xlu0 %v398_v20  ;;  %408 = vadd.xlane.f32.xlu1 %v407_v21  ;;  %v369_v22 = vsub.f32 %v353_v17, %v290_v16  ;;  %v609_v23 = vpop.f32.mrb[6].mxu0  ;;  %v665_v24 = vpop.f32.mrb[6].mxu1  ;;  %v404_v32 = vsel %vm397_vm0, %v383_v18, 0.0 }
 0x104   :  { %v386_v25 = vmul.f32 0.5, %v370_v19  ;;  %v356_v26 = vmul.f32 %v609_v23, %v609_v23  ;;  %v139_v27 = vpop.f32.mrb[7].mxu0  ;;  %v300_v28 = vpop.f32.mrb[7].mxu1 }
 0x105   :  { %v385_v29 = vmul.f32 0.5, %v369_v22  ;;  %v355_v30 = vmul.f32 %v139_v27, %v139_v27 }
 0x106   :  { %v372_v31 = vsub.f32 %v356_v26, %v665_v24  ;;  %v413_v40 = vsel %vm397_vm0, %v386_v25, 0.0 }
 0x107   :  { %405 = vadd.xlane.f32.xlu1 %v404_v32  ;;  %v371_v33 = vsub.f32 %v355_v30, %v300_v28  ;;  %v612_v34 = vpop.f32.mrb[8].mxu0  ;;  %v410_v35 = vsel %vm397_vm0, %v385_v29, 0.0  ;;  %v668_v36 = vpop.f32.mrb[8].mxu1 }
 0x108   :  { %v388_v37 = vmul.f32 0.5, %v372_v31  ;;  %v358_v38 = vmul.f32 %v612_v34, %v612_v34  ;;  %411 = vadd.xlane.f32.xlu0 %v410_v35  ;;  %v149_v39 = vpop.f32.mrb[9].mxu0  ;;  %v310_v41 = vpop.f32.mrb[9].mxu1 }
 0x109   :  { %v387_v42 = vmul.f32 0.5, %v371_v33  ;;  %v357_v43 = vmul.f32 %v149_v39, %v149_v39 }
 0x10a   :  { %v374_v44 = vsub.f32 %v358_v38, %v668_v36  ;;  %v419_v52 = vsel %vm397_vm0, %v388_v37, 0.0 }
 0x10b   :  { %414 = vadd.xlane.f32.xlu1 %v413_v40  ;;  %v373_v45 = vsub.f32 %v357_v43, %v310_v41  ;;  %v615_v46 = vpop.f32.mrb[10].mxu0  ;;  %v416_v47 = vsel %vm397_vm0, %v387_v42, 0.0  ;;  %v671_v48 = vpop.f32.mrb[10].mxu1 }
 0x10c   :  { %v390_v49 = vmul.f32 0.5, %v374_v44  ;;  %v360_v50 = vmul.f32 %v615_v46, %v615_v46  ;;  %417 = vadd.xlane.f32.xlu0 %v416_v47  ;;  %v159_v51 = vpop.f32.mrb[11].mxu0  ;;  %v320_v53 = vpop.f32.mrb[11].mxu1 }
 0x10d   :  { %v389_v54 = vmul.f32 0.5, %v373_v45  ;;  %v359_v55 = vmul.f32 %v159_v51, %v159_v51 }
 0x10e   :  { %v376_v56 = vsub.f32 %v360_v50, %v671_v48  ;;  %v425_v0 = vsel %vm397_vm0, %v390_v49, 0.0 }
 0x10f   :  { %420 = vadd.xlane.f32.xlu1 %v419_v52  ;;  %v375_v57 = vsub.f32 %v359_v55, %v320_v53  ;;  %v618_v58 = vpop.f32.mrb[12].mxu0  ;;  %v422_v59 = vsel %vm397_vm0, %v389_v54, 0.0  ;;  %v674_v60 = vpop.f32.mrb[12].mxu1 }
 0x110   :  { %v392_v61 = vmul.f32 0.5, %v376_v56  ;;  %v362_v62 = vmul.f32 %v618_v58, %v618_v58  ;;  %423 = vadd.xlane.f32.xlu0 %v422_v59  ;;  %v169_v63 = vpop.f32.mrb[13].mxu0  ;;  %v330_v1 = vpop.f32.mrb[13].mxu1 }
 0x111   :  { %v391_v2 = vmul.f32 0.5, %v375_v57  ;;  %v361_v3 = vmul.f32 %v169_v63, %v169_v63 }
 0x112   :  { %v378_v4 = vsub.f32 %v362_v62, %v674_v60  ;;  %v431_v12 = vsel %vm397_vm0, %v392_v61, 0.0 }
 0x113   :  { %426 = vadd.xlane.f32.xlu1 %v425_v0  ;;  %v377_v5 = vsub.f32 %v361_v3, %v330_v1  ;;  %v621_v6 = vpop.f32.mrb[14].mxu0  ;;  %v428_v7 = vsel %vm397_vm0, %v391_v2, 0.0  ;;  %v677_v8 = vpop.f32.mrb[14].mxu1 }
 0x114   :  { %v394_v9 = vmul.f32 0.5, %v378_v4  ;;  %v364_v10 = vmul.f32 %v621_v6, %v621_v6  ;;  %429 = vadd.xlane.f32.xlu0 %v428_v7  ;;  %v179_v11 = vpop.f32.mrb[15].mxu0  ;;  %v340_v13 = vpop.f32.mrb[15].mxu1 }
 0x115   :  { %v393_v14 = vmul.f32 0.5, %v377_v5  ;;  %v363_v15 = vmul.f32 %v179_v11, %v179_v11 }
 0x116   :  { %v380_v16 = vsub.f32 %v364_v10, %v677_v8  ;;  %v437_v20 = vsel %vm397_vm0, %v394_v9, 0.0 }
 0x117   :  { %432 = vadd.xlane.f32.xlu1 %v431_v12  ;;  %v379_v17 = vsub.f32 %v363_v15, %v340_v13  ;;  %v434_v18 = vsel %vm397_vm0, %v393_v14, 0.0 }
 0x118   :  { %v396_v19 = vmul.f32 0.5, %v380_v16  ;;  %435 = vadd.xlane.f32.xlu0 %v434_v18 }
 0x119   :  { %v395_v21 = vmul.f32 0.5, %v379_v17 }
 0x11a   :  { %v443_v23 = vsel %vm397_vm0, %v396_v19, 0.0 }
 0x11b   :  { %438 = vadd.xlane.f32.xlu1 %v437_v20  ;;  %v440_v22 = vsel %vm397_vm0, %v395_v21, 0.0 }
 0x11c   :  { %441 = vadd.xlane.f32.xlu0 %v440_v22 }
 0x11f   :  { %444 = vadd.xlane.f32.xlu1 %v443_v23 }
 0x18c   :  { %v403_v24 = vpop.xlane.xlu0 %402 }
 0x190   :  { %v400_v25 = vpop.xlane.xlu0 %399  ;;  %v409_v26 = vpop.xlane.xlu1 %408 }
 0x191   :  { %447 = vst.msk [vmem:[#allocation2] sm:$0xff] %vm446_vm1, %v400_v25 }
 0x194   :  { %v406_v27 = vpop.xlane.xlu1 %405 }
 0x195   :  { %v412_v28 = vpop.xlane.xlu0 %411 }
 0x198   :  { %v480_v29 = vld [vmem:[#allocation2] sm:$0x3]  ;;  %v415_v30 = vpop.xlane.xlu1 %414 }
 0x199   :  { %481 = vst [vmem:[%s874_s2] sm:$0x3] %v480_v29  ;;  %v418_v31 = vpop.xlane.xlu0 %417 }
 0x19c   :  { %v421_v32 = vpop.xlane.xlu1 %420 }
 0x19d   :  { %v424_v33 = vpop.xlane.xlu0 %423 }
 0x1a0   :  { %v427_v34 = vpop.xlane.xlu1 %426 }
 0x1a1   :  { %v430_v35 = vpop.xlane.xlu0 %429 }
 0x1a4   :  { %v433_v36 = vpop.xlane.xlu1 %432 }
 0x1a5   :  { %v436_v37 = vpop.xlane.xlu0 %435 }
 0x1a8   :  { %v439_v38 = vpop.xlane.xlu1 %438 }
 0x1a9   :  { %v442_v39 = vpop.xlane.xlu0 %441 }
 0x1ac   :  { %v445_v40 = vpop.xlane.xlu1 %444 }

</bundles_post_ra>
